<compile_context>
chip_gen: v7x
topology: tpu7x:2x2x1
jax: 0.10.0
libtpu: 0.0.40
codegen_flags: <defaults>
</compile_context>

<pallas_src>
import jax
import jax.numpy as jnp
from jax.experimental import pallas as pl
from jax.experimental.pallas import tpu as pltpu


def _projection_kernel(x_ref, w_ref, b_ref, o_ref):
    """One (tm, tn) output tile: full-K matmul + bias, written directly."""
    x = x_ref[...].astype(w_ref.dtype)            # in-kernel bf16 cast (VPU)
    acc = jnp.dot(x, w_ref[...], preferred_element_type=jnp.float32)
    o_ref[...] = (acc + b_ref[...]).astype(o_ref.dtype)


def prepare_projection_weight(weight, compute_dtype=jnp.bfloat16):
    """PyTorch [P, H] nn.Linear weight -> [H, P] kernel layout, cast once.

    Call this once at model-load time, NOT per forward call, so the transpose
    + cast is not a per-invocation HBM round-trip of the constant parameter.
    """
    return jnp.asarray(weight, compute_dtype).T


def _pick_tiles(M, H, P):
    # K never tiled: H (1152 for PaliGemma) fits comfortably in VMEM; a single
    # K block removes the accumulator and the reduction grid axis entirely.
    tk = H
    # N tile: whole projection_dim when it is a single lane-dense slab
    # (P = 2048 in production -> one ~4.5 MB bf16 weight tile), else a
    # 128-multiple chunk.
    if P <= 2048 or P % 2048 != 0:
        tn = P
    else:
        tn = 2048
    # M tile: 512-class row blocks sit near the HBM roofline; full extent for
    # toy shapes (block == full dim satisfies the (8,128) rule). Prefer a
    # divisor of M to avoid partial-tile masked stores when possible.
    if M <= 512:
        tm = M
    else:
        tm = 512
        for cand in (512, 384, 256, 128):
            if M % cand == 0:
                tm = cand
                break
    return tm, tn, tk


def _vmem_limit_bytes(tm, tn, tk, x_itemsize, w_itemsize, out_itemsize):
    per_step = (
        tm * tk * x_itemsize      # x tile (native dtype, cast in-kernel)
        + tk * tn * w_itemsize    # weight tile (resident, but budget 2 bufs)
        + tn * 4                  # bias tile (f32)
        + tm * tn * out_itemsize  # output tile
    )
    need = 2 * per_step + (1 << 20)           # double-buffering + slack
    # 16 MiB floor (plenty for toy shapes), 48 MiB ceiling (safe under v7x's
    # 64 MiB physical VMEM; v5e/v6e have 128 MiB physical).
    return int(min(max(need * 5 // 4, 16 << 20), 48 << 20))


def paligemma_mm_projection(images_embed, w_hp, bias, *, out_dtype=None,
                            tm=None, tn=None, tk=None):
    """Forward of PaliGemmaMultiModalProjection.

    images_embed: [B, S, H]   (batch, num_image_tokens, vision hidden_size)
    w_hp:         [H, P]      pre-prepared weight (prepare_projection_weight)
    bias:         [P]
    returns:      [B, S, P]   in `out_dtype` (default: images_embed.dtype)
    """
    B, S, H = images_embed.shape
    Hw, P = w_hp.shape
    assert Hw == H, f"weight K dim {Hw} != hidden size {H}"
    M = B * S
    out_dtype = out_dtype or images_embed.dtype

    # Free reshape (contiguous); NO dtype cast here — the bf16 cast happens
    # inside the kernel so x crosses HBM exactly once in its native dtype.
    x2 = images_embed.reshape(M, H)
    b2 = jnp.asarray(bias, jnp.float32).reshape(1, P)

    atm, atn, atk = _pick_tiles(M, H, P)
    tm = tm or atm
    tn = tn or atn
    tk = tk or atk
    assert tk == H, "kernel assumes a single (un-tiled) K block"

    # (N outermost, M innermost): the weight/bias block index only changes
    # when j changes, so they are DMA'd once per N tile and reused across all
    # M tiles. Both axes are fully parallel (no reduction axis).
    grid = (pl.cdiv(P, tn), pl.cdiv(M, tm))

    vmem_limit = _vmem_limit_bytes(
        tm, tn, tk,
        jnp.dtype(x2.dtype).itemsize,
        jnp.dtype(w_hp.dtype).itemsize,
        jnp.dtype(out_dtype).itemsize,
    )

    out = pl.pallas_call(
        _projection_kernel,
        out_shape=jax.ShapeDtypeStruct((M, P), out_dtype),
        grid_spec=pltpu.PrefetchScalarGridSpec(
            num_scalar_prefetch=0,
            grid=grid,
            in_specs=[
                pl.BlockSpec((tm, tk), lambda j, i: (i, 0)),  # x rows (full K)
                pl.BlockSpec((tk, tn), lambda j, i: (0, j)),  # weight: resident over i
                pl.BlockSpec((1, tn), lambda j, i: (0, j)),   # bias:   resident over i
            ],
            out_specs=pl.BlockSpec((tm, tn), lambda j, i: (i, j)),
        ),
        compiler_params=pltpu.CompilerParams(
            dimension_semantics=("parallel", "parallel"),
            vmem_limit_bytes=vmem_limit,
        ),
    )(x2, w_hp, b2)

    return out.reshape(B, S, P)


if __name__ == "__main__":
    # Small shapes consistent with the module:
    #   vision hidden_size H = 32, projection_dim P = 64,
    #   batch B = 2, num_image_tokens S = 8.
    # (Real PaliGemma: H=1152, P=2048, S=256 — tile heuristic handles both.)
    B, S, H, P = 2, 8, 32, 64

    key = jax.random.PRNGKey(0)
    k_x, k_w, k_b = jax.random.split(key, 3)

    images_embed = jax.random.normal(k_x, (B, S, H), dtype=jnp.float32)
    bound = 1.0 / (H ** 0.5)
    weight = jax.random.uniform(k_w, (P, H), minval=-bound, maxval=bound,
                                dtype=jnp.float32)   # PyTorch layout [out, in]
    bias = jax.random.uniform(k_b, (P,), minval=-bound, maxval=bound,
                              dtype=jnp.float32)

    # One-time weight preparation (transpose + bf16 cast), outside the hot path.
    w_hp = prepare_projection_weight(weight)         # [H, P] bfloat16

    out = paligemma_mm_projection(images_embed, w_hp, bias)
    out = jax.block_until_ready(out)

    # Reference with the same bf16 input/weight precision and f32 accumulate
    # (matches MXU semantics), plus a coarse check against the full-f32 Linear.
    x_bf = images_embed.astype(jnp.bfloat16).astype(jnp.float32)
    w_bf = weight.astype(jnp.bfloat16).astype(jnp.float32)
    ref_bf16_inputs = x_bf @ w_bf.T + bias
    ref_f32 = images_embed @ weight.T + bias

    assert out.shape == (B, S, P)
    assert out.dtype == images_embed.dtype
    assert jnp.allclose(out, ref_bf16_inputs, atol=1e-4, rtol=1e-4)
    assert jnp.allclose(out, ref_f32, atol=5e-2, rtol=5e-2)

    print("KERNEL_OK")
</pallas_src>

<mosaic_0001>
module attributes {stable_mosaic.version = 11 : i64} {
  func.func @_projection_kernel(%arg0: i32, %arg1: i32, %arg2: memref<16x32xf32, #tpu.memory_space<vmem>>, %arg3: memref<32x64xbf16, #tpu.memory_space<vmem>>, %arg4: memref<1x64xf32, #tpu.memory_space<vmem>>, %arg5: memref<16x64xf32, #tpu.memory_space<vmem>>) attributes {dimension_semantics = [#tpu.dimension_semantics<parallel>, #tpu.dimension_semantics<parallel>], iteration_bounds = array<i64: 1, 1>, scalar_prefetch = 0 : i64, scratch_operands = 0 : i64, tpu.core_type = #tpu.core_type<tc>, window_params = [{transform_indices = @transform_0, window_bounds = array<i64: 16, 32>}, {transform_indices = @transform_1, window_bounds = array<i64: 32, 64>}, {transform_indices = @transform_2, window_bounds = array<i64: 1, 64>}, {transform_indices = @transform_3, window_bounds = array<i64: 16, 64>}]} {
    %c0 = arith.constant 0 : index
    %c0_0 = arith.constant 0 : index
    %0 = vector.load %arg2[%c0, %c0_0] : memref<16x32xf32, #tpu.memory_space<vmem>>, vector<16x32xf32>
    %1 = arith.truncf %0 : vector<16x32xf32> to vector<16x32xbf16>
    %c0_1 = arith.constant 0 : index
    %c0_2 = arith.constant 0 : index
    %2 = vector.load %arg3[%c0_1, %c0_2] : memref<32x64xbf16, #tpu.memory_space<vmem>>, vector<32x64xbf16>
    %cst = arith.constant dense<0.000000e+00> : vector<16x64xf32>
    %3 = tpu.matmul %1, %2, %cst {dimension_numbers = #tpu.dot_dimension_numbers<[1], [0], [0], [1], [0, 0, 1, 1], [], []>} : vector<16x32xbf16>, vector<32x64xbf16>, vector<16x64xf32> -> vector<16x64xf32>
    %c0_3 = arith.constant 0 : index
    %c0_4 = arith.constant 0 : index
    %4 = vector.load %arg4[%c0_3, %c0_4] : memref<1x64xf32, #tpu.memory_space<vmem>>, vector<1x64xf32>
    %5 = vector.broadcast %4 : vector<1x64xf32> to vector<16x64xf32>
    %6 = arith.addf %3, %5 : vector<16x64xf32>
    %c0_5 = arith.constant 0 : index
    %c0_6 = arith.constant 0 : index
    %7 = vector.load %arg5[%c0_5, %c0_6] : memref<16x64xf32, #tpu.memory_space<vmem>>, vector<16x64xf32>
    tpu.vector_store %arg5[%c0_5, %c0_6], %6 {strides = array<i32>} : memref<16x64xf32, #tpu.memory_space<vmem>>, vector<16x64xf32>,
    return
  }
  func.func @transform_0(%arg0: i32, %arg1: i32) -> (i32, i32) {
    %c0_i32 = arith.constant 0 : i32
    %c0_i32_0 = arith.constant 0 : i32
    return %arg1, %c0_i32 : i32, i32
  }
  func.func @transform_1(%arg0: i32, %arg1: i32) -> (i32, i32) {
    %c0_i32 = arith.constant 0 : i32
    %c0_i32_0 = arith.constant 0 : i32
    return %c0_i32, %arg0 : i32, i32
  }
  func.func @transform_2(%arg0: i32, %arg1: i32) -> (i32, i32) {
    %c0_i32 = arith.constant 0 : i32
    %c0_i32_0 = arith.constant 0 : i32
    return %c0_i32, %arg0 : i32, i32
  }
  func.func @transform_3(%arg0: i32, %arg1: i32) -> (i32, i32) {
    %c0_i32 = arith.constant 0 : i32
    return %arg1, %arg0 : i32, i32
  }
}

</mosaic_0001>

<bundles_post_ra>
// kernel: tpu_custom_call.1
= control target key start
LH: loop header
LB: loop body
LE: loop exit
PB: predicated region body
PF: predicated region fallthrough
CT: control target
= control target key end

     0   :  { %8 = vsyncpa [#allocation3], 0  ;;  %s308_s0 = inlined_call_operand.hbm [shape: f32[16,32], index: 0, kind: input, shape index: {}]   ;;  %s309_s1 = inlined_call_operand.hbm [shape: bf16[32,64], index: 1, kind: input, shape index: {}]   ;;  %s310_s2 = inlined_call_operand.vmem [shape: f32[1,64], index: 2, kind: input, shape index: {}]   ;;  %s311_s3 = inlined_call_operand.hbm [shape: f32[16,64], index: 3, kind: output, shape index: {}]  }
   0x1   :  { %9 = vsyncpa [#allocation6], 0 }
   0x2   :  { %10 = vsyncpa [#allocation4], 0  ;;  %s234_s12 = smov [#allocation2]   ;;  %s162_s16 = scalar_lea.hbm %s308_s0, 256 }
   0x3   :  { %s16_s13 = sshll.u32 %s234_s12, 4  ;;  %p163_p0 = scmp.ne.s32.totalorder %s308_s0, %s162_s16  ;;  %s17_s13 = int_to_ptr.vmem [resolvable:$true] %s16_s13 }
   0x4   :  { %p166_p1 = scmp.lt.u32.totalorder %s162_s16, %s308_s0 }
   0x6   :  { %p168_p2 = pnand %p166_p1, %p163_p0 }
   0x8   :  { %171 = shalt.err (!%p168_p2)
}
   0x9   :  { %s172_s21 = scalar_lea.vmem %s17_s13, 256  ;;  %p177_p4 = scmp.lt.s32.totalorder %s17_s13, %s17_s13 }
   0xa   :  { %p173_p3 = scmp.ne.s32.totalorder %s17_s13, %s172_s21  ;;  %p178_p5 = scmp.lt.s32.totalorder %s172_s21, %s172_s21 }
   0xc   :  { %p179_p6 = por %p178_p5, %p177_p4 }
   0xe   :  { %p180_p7 = pnand %p179_p6, %p173_p3 }
  0x10   :  { %183 = shalt.err (!%p180_p7)
}
  0x11   :  { %s235_s22 = smov 128   ;;  %s236_s23 = smov 8  }
  0x12   :  { %22 = dma.hbm_to_vmem [thread:$0]  %s308_s0, 256, %s17_s13, [#allocation3], %s235_s22, %s235_s22, %s236_s23  }
  0x13   :  { %s237_s26 = smov [#allocation5]   ;;  %s184_s30 = scalar_lea.hbm %s309_s1, 256 }
  0x14   :  { %s28_s27 = sshll.u32 %s237_s26, 4  ;;  %p185_p8 = scmp.ne.s32.totalorder %s309_s1, %s184_s30  ;;  %s29_s27 = int_to_ptr.vmem [resolvable:$true] %s28_s27 }
  0x15   :  { %p188_p9 = scmp.lt.u32.totalorder %s184_s30, %s309_s1 }
  0x17   :  { %p190_p10 = pnand %p188_p9, %p185_p8 }
  0x19   :  { %193 = shalt.err (!%p190_p10)
}
  0x1a   :  { %s194_s8 = scalar_lea.vmem %s29_s27, 256  ;;  %p199_p12 = scmp.lt.s32.totalorder %s29_s27, %s29_s27 }
  0x1b   :  { %p195_p11 = scmp.ne.s32.totalorder %s29_s27, %s194_s8  ;;  %p200_p13 = scmp.lt.s32.totalorder %s194_s8, %s194_s8 }
  0x1d   :  { %p201_p0 = por %p200_p13, %p199_p12 }
  0x1f   :  { %p202_p1 = pnand %p201_p0, %p195_p11 }
  0x21   :  { %205 = shalt.err (!%p202_p1)
}
  0x22   :  { %s238_s0 = smov 64   ;;  %s239_s9 = smov 4  }
  0x23   :  { %34 = dma.hbm_to_vmem [thread:$0]  %s309_s1, 256, %s29_s27, [#allocation6], %s238_s0, %s238_s0, %s239_s9  }
  0x24   :  { %228 = dma.done.wait [#allocation3], 256  }
  0x25   :  { %229 = vsyncadd [#allocation3], 4294967040 }
  0x26   :  { %230 = dma.done.wait [#allocation6], 256  }
  0x27   :  { %231 = vsyncadd [#allocation6], 4294967040  ;;  %v240_v0 = vmov 0.0   ;;  %vm241_vm0 = vmmov 0   ;;  %v160_v1 = vld [vmem:[#allocation5] sm:$0xff]   ;;  %v161_v2 = vld [vmem:[#allocation5 + $0x8] sm:$0xff]  }
  0x28   :  { %143 = vmatprep.subr.bf16.mxu0 %v240_v0  ;;  %147 = vmatprep.mubr.msk.bf16.mxu0 %vm241_vm0, %v240_v0  ;;  %v44_v3 = vld [vmem:[#allocation2] sm:$0xff]  ;;  %v45_v4 = vld [vmem:[#allocation2 + $0x8] sm:$0xff]  ;;  %vm70_vm1 = vcmask 261120   ;;  %vm115_vm2 = vcmask 523264   ;;  %s242_s13 = smov [#allocation7]  }
  0x29   :  { %144 = vmatpush3.bf16.msra.mxu0 %v160_v1  ;;  %v46_v5 = vpack.c.bf16 %v45_v4, %v44_v3  ;;  %v136_v6 = vld [vmem:[%s310_s2] ss:$0 sm:$0xff]  ;;  %s123_s14 = sshll.u32 %s242_s13, 4  ;;  %s124_s14 = int_to_ptr.vmem [resolvable:$true] %s123_s14 }
  0x2a   :  { %145 = vmatprep.subr.bf16.mxu0 %v240_v0  ;;  %s206_s15 = scalar_lea.vmem %s124_s14, 256  ;;  %p211_p3 = scmp.lt.s32.totalorder %s124_s14, %s124_s14 }
  0x2b   :  { %p207_p2 = scmp.ne.s32.totalorder %s124_s14, %s206_s15  ;;  %p212_p4 = scmp.lt.s32.totalorder %s206_s15, %s206_s15 }
  0x2d   :  { %146 = vmatpush3.bf16.msra.mxu0 %v161_v2  ;;  %p213_p5 = por %p212_p4, %p211_p3 }
  0x2f   :  { %p214_p6 = pnand %p213_p5, %p207_p2 }
  0x30   :  { %148 = vmatmul.mubr.msk.bf16.vlgmr.msra.gmra.mrb[0].mxu0 %vm70_vm1, %v46_v5 }
 0x103   :  { %v108_v7 = vpop.f32.mrb[0].mxu0 }
 0x104   :  { %v109_v8 = vadd.f32 %v136_v6, %v108_v7  ;;  %v149_v9 = vpop.f32.mrb[1].mxu0 }
 0x105   :  { %v111_v10 = vpop.f32.mrb[2].mxu0 }
 0x106   :  { %v112_v11 = vadd.f32 %v136_v6, %v111_v10  ;;  %v150_v12 = vpop.f32.mrb[3].mxu0  ;;  %116 = vst.msk [vmem:[#allocation7] sm:$0xff] %vm115_vm2, %v109_v8 }
 0x108   :  { %117 = vst.msk [vmem:[#allocation7 + $0x8] sm:$0xff] %vm115_vm2, %v112_v11 }
 0x109   :  { %217 = shalt.err (!%p214_p6)
}
 0x10a   :  { %s218_s17 = scalar_lea.hbm %s311_s3, 256 }
 0x10b   :  { %p219_p7 = scmp.ne.s32.totalorder %s311_s3, %s218_s17  ;;  %p222_p8 = scmp.lt.u32.totalorder %s218_s17, %s311_s3 }
 0x10d   :  { %p224_p9 = pnand %p222_p8, %p219_p7 }
 0x10f   :  { %227 = shalt.err (!%p224_p9)
}
 0x110   :  { %129 = dma.vmem_to_hbm [thread:$0]  %s124_s14, 256, %s311_s3, [#allocation4], %s235_s22, %s235_s22, %s236_s23  }
 0x111   :  { %232 = dma.done.wait [#allocation4], 256  }
 0x112   :  { %233 = vsyncadd [#allocation4], 4294967040 }
 0x113   :  { %133 = vsyncpa [#allocation3], 1 }
 0x114   :  { %134 = vsyncpa [#allocation6], 1 }
 0x115   :  { %135 = vsyncpa [#allocation4], 1 }

</bundles_post_ra>
